<compile_context>
chip_gen: v7x
topology: tpu7x:2x2x1
jax: 0.10.0
libtpu: 0.0.40
codegen_flags: <defaults>
</compile_context>

<pallas_src>
import jax
import jax.numpy as jnp
from jax.experimental import pallas as pl
from jax.experimental.pallas import tpu as pltpu


def _round_up(x, m):
    return ((x + m - 1) // m) * m


def _ortho_kernel(p_ref, t_ref, acc_ref):
    # p_ref / t_ref: (tile_rows, 128) chunk of one sample's flattened features.
    # acc_ref:       (8, 128) lane-dense partial-sum accumulator (output block,
    #                resident across the contraction grid axis).
    k = pl.program_id(1)

    @pl.when(k == 0)
    def _():
        acc_ref[...] = jnp.zeros_like(acc_ref)

    prod = p_ref[...].astype(jnp.float32) * t_ref[...].astype(jnp.float32)
    # (tile_rows, 128) -> (tile_rows // 8, 8, 128): summing over axis 0 is
    # plain vreg-to-vreg VPU adds (no cross-lane/XLU work in the hot loop).
    acc_ref[...] += jnp.sum(prod.reshape(-1, 8, 128), axis=0)


def ortho_loss(pred, target, *, max_tile_rows=2048):
    """pred, target: arrays of identical shape (B, ...). Returns scalar f32 loss."""
    assert pred.shape == target.shape
    b = pred.shape[0]
    d = 1
    for s in pred.shape[1:]:
        d *= int(s)

    p = pred.reshape(b, d)
    t = target.reshape(b, d)

    # Tile the flattened feature axis as (rows, 128); rows padded to a multiple
    # of the row tile.  Zero padding contributes nothing to the dot product and
    # normalization below uses the true D.  max_tile_rows=2048 keeps each f32
    # input tile at 1 MiB (2 inputs x 2 pipeline buffers = 4 MiB), comfortably
    # inside the scoped-VMEM limit on v5e/v6e/v7x.
    rows_raw = _round_up(d, 128) // 128
    tile_rows = min(int(max_tile_rows), _round_up(rows_raw, 8))
    rows = _round_up(rows_raw, tile_rows)
    d_pad = rows * 128
    if d_pad != d:
        p = jnp.pad(p, ((0, 0), (0, d_pad - d)))
        t = jnp.pad(t, ((0, 0), (0, d_pad - d)))
    p3 = p.reshape(b, rows, 128)
    t3 = t.reshape(b, rows, 128)

    n_chunks = rows // tile_rows

    feat_spec = pl.BlockSpec(
        (pl.Squeezed(), tile_rows, 128), lambda i, k: (i, k, 0)
    )

    partial = pl.pallas_call(
        _ortho_kernel,
        out_shape=jax.ShapeDtypeStruct((b, 8, 128), jnp.float32),
        grid_spec=pltpu.PrefetchScalarGridSpec(
            num_scalar_prefetch=0,
            grid=(b, n_chunks),
            in_specs=[feat_spec, feat_spec],
            out_specs=pl.BlockSpec(
                (pl.Squeezed(), 8, 128), lambda i, k: (i, 0, 0)
            ),
        ),
        compiler_params=pltpu.CompilerParams(
            # Batch axis can be sharded across TensorCores (v7x megacore);
            # the feature-chunk axis is a per-sample reduction.
            dimension_semantics=("parallel", "arbitrary"),
        ),
    )(p3, t3)

    # Tiny final reduction outside the kernel: per-sample dot, square, /D, mean.
    dots = jnp.sum(partial, axis=(1, 2))  # (B,)
    return jnp.mean(dots * dots) / jnp.float32(d)


def ortho_loss_ref(pred, target):
    """Pure-JAX reference matching the PyTorch module semantics."""
    b = pred.shape[0]
    p = pred.reshape(b, -1).astype(jnp.float32)
    t = target.reshape(b, -1).astype(jnp.float32)
    d = p.shape[1]
    dots = jnp.sum(p * t, axis=1)         # pred_i @ target_i^T is 1x1 -> its mean is itself
    return jnp.mean(dots * dots / d)


if __name__ == "__main__":
    key = jax.random.PRNGKey(0)
    k1, k2 = jax.random.split(key)
    B, C, H, W = 2, 4, 16, 16
    pred = jax.random.normal(k1, (B, C, H, W), dtype=jnp.float32)
    target = jax.random.normal(k2, (B, C, H, W), dtype=jnp.float32)

    out = jax.block_until_ready(ortho_loss(pred, target))
    ref = jax.block_until_ready(ortho_loss_ref(pred, target))
    assert jnp.allclose(out, ref, rtol=1e-5, atol=1e-6), (out, ref)
    print("KERNEL_OK")
</pallas_src>

<mosaic_0001>
module attributes {stable_mosaic.version = 11 : i64} {
  func.func @_ortho_kernel(%arg0: i32, %arg1: i32, %arg2: memref<1x8x128xf32, #tpu.memory_space<vmem>>, %arg3: memref<1x8x128xf32, #tpu.memory_space<vmem>>, %arg4: memref<1x8x128xf32, #tpu.memory_space<vmem>>) attributes {dimension_semantics = [#tpu.dimension_semantics<parallel>, #tpu.dimension_semantics<arbitrary>], iteration_bounds = array<i64: 2, 1>, scalar_prefetch = 0 : i64, scratch_operands = 0 : i64, tpu.core_type = #tpu.core_type<tc>, window_params = [{transform_indices = @transform_0, window_bounds = array<i64: 1, 8, 128>}, {transform_indices = @transform_1, window_bounds = array<i64: 1, 8, 128>}, {transform_indices = @transform_2, window_bounds = array<i64: 1, 8, 128>}]} {
    %c0_i32 = arith.constant 0 : i32
    %0 = arith.cmpi eq, %arg1, %c0_i32 : i32
    %1 = arith.extui %0 : i1 to i32
    %c0_i32_0 = arith.constant 0 : i32
    %2 = arith.cmpi ne, %1, %c0_i32_0 : i32
    scf.if %2 {
      %cst_12 = arith.constant 0.000000e+00 : f32
      %16 = vector.broadcast %cst_12 : f32 to vector<8x128xf32>
      %c0_13 = arith.constant 0 : index
      %c0_14 = arith.constant 0 : index
      %c0_15 = arith.constant 0 : index
      %17 = vector.load %arg4[%c0_13, %c0_14, %c0_15] : memref<1x8x128xf32, #tpu.memory_space<vmem>>, vector<1x8x128xf32>
      %18 = vector.shape_cast %17 : vector<1x8x128xf32> to vector<8x128xf32>
      %19 = vector.shape_cast %16 : vector<8x128xf32> to vector<1x8x128xf32>
      tpu.vector_store %arg4[%c0_13, %c0_14, %c0_15], %19 {strides = array<i32>} : memref<1x8x128xf32, #tpu.memory_space<vmem>>, vector<1x8x128xf32>,
    } else {
    }
    %c0 = arith.constant 0 : index
    %c0_1 = arith.constant 0 : index
    %c0_2 = arith.constant 0 : index
    %3 = vector.load %arg2[%c0, %c0_1, %c0_2] : memref<1x8x128xf32, #tpu.memory_space<vmem>>, vector<1x8x128xf32>
    %4 = vector.shape_cast %3 : vector<1x8x128xf32> to vector<8x128xf32>
    %c0_3 = arith.constant 0 : index
    %c0_4 = arith.constant 0 : index
    %c0_5 = arith.constant 0 : index
    %5 = vector.load %arg3[%c0_3, %c0_4, %c0_5] : memref<1x8x128xf32, #tpu.memory_space<vmem>>, vector<1x8x128xf32>
    %6 = vector.shape_cast %5 : vector<1x8x128xf32> to vector<8x128xf32>
    %7 = arith.mulf %4, %6 : vector<8x128xf32>
    %c0_6 = arith.constant 0 : index
    %c0_7 = arith.constant 0 : index
    %c0_8 = arith.constant 0 : index
    %8 = vector.load %arg4[%c0_6, %c0_7, %c0_8] : memref<1x8x128xf32, #tpu.memory_space<vmem>>, vector<1x8x128xf32>
    %9 = vector.shape_cast %8 : vector<1x8x128xf32> to vector<8x128xf32>
    %10 = vector.shape_cast %7 : vector<8x128xf32> to vector<1x8x128xf32>
    %cst = arith.constant dense<0.000000e+00> : vector<8x128xf32>
    %11 = vector.multi_reduction <add>, %10, %cst [0] : vector<1x8x128xf32> to vector<8x128xf32>
    %12 = arith.addf %9, %11 : vector<8x128xf32>
    %c0_9 = arith.constant 0 : index
    %c0_10 = arith.constant 0 : index
    %c0_11 = arith.constant 0 : index
    %13 = vector.load %arg4[%c0_9, %c0_10, %c0_11] : memref<1x8x128xf32, #tpu.memory_space<vmem>>, vector<1x8x128xf32>
    %14 = vector.shape_cast %13 : vector<1x8x128xf32> to vector<8x128xf32>
    %15 = vector.shape_cast %12 : vector<8x128xf32> to vector<1x8x128xf32>
    tpu.vector_store %arg4[%c0_9, %c0_10, %c0_11], %15 {strides = array<i32>} : memref<1x8x128xf32, #tpu.memory_space<vmem>>, vector<1x8x128xf32>,
    return
  }
  func.func @transform_0(%arg0: i32, %arg1: i32) -> (i32, i32, i32) {
    %c0_i32 = arith.constant 0 : i32
    %c0_i32_0 = arith.constant 0 : i32
    return %arg0, %arg1, %c0_i32 : i32, i32, i32
  }
  func.func @transform_1(%arg0: i32, %arg1: i32) -> (i32, i32, i32) {
    %c0_i32 = arith.constant 0 : i32
    %c0_i32_0 = arith.constant 0 : i32
    return %arg0, %arg1, %c0_i32 : i32, i32, i32
  }
  func.func @transform_2(%arg0: i32, %arg1: i32) -> (i32, i32, i32) {
    %c0_i32 = arith.constant 0 : i32
    %c0_i32_0 = arith.constant 0 : i32
    %c0_i32_1 = arith.constant 0 : i32
    return %arg0, %c0_i32, %c0_i32_0 : i32, i32, i32
  }
}

</mosaic_0001>

<bundles_post_ra>
// kernel: tpu_custom_call.1
= control target key start
LH: loop header
LB: loop body
LE: loop exit
PB: predicated region body
PF: predicated region fallthrough
CT: control target
= control target key end

     0   :  { %7 = vsyncpa [#allocation3], 0  ;;  %s813_s0 = inlined_call_operand.hbm [shape: f32[2,8,128], index: 0, kind: input, shape index: {}]   ;;  %s814_s1 = inlined_call_operand.hbm [shape: f32[2,8,128], index: 1, kind: input, shape index: {}]   ;;  %s815_s2 = inlined_call_operand.hbm [shape: f32[2,8,128], index: 2, kind: output, shape index: {}]  }
   0x1   :  { %9 = vsyncpa [#allocation3 + $0x1], 0 }
   0x2   :  { %10 = vsyncpa [#allocation6], 0 }
   0x3   :  { %12 = vsyncpa [#allocation6 + $0x1], 0 }
   0x4   :  { %13 = vsyncpa [#allocation4], 0 }
   0x5   :  { %15 = vsyncpa [#allocation4 + $0x1], 0  ;;  %s593_s9 = smov 0   ;;  %s595_s10 = smov 0  }
   0x6   :  { %s597_s11 = smov 0   ;;  %s599_s12 = smov 0  }
   0x7   :  { %s601_s13 = smov 0   ;;  %s603_s14 = smov 0  }
   0x8 LB: > { %s343_s15 = sadd.s32 4294967295, %s573_s14   ;;  %s344_s16 = sadd.s32 4294967294, %s573_s14   ;;  %s573_s14 = sphi %s603_s14, %s21_s14   ;;  %s569_s13 = sphi %s601_s13, %s835_s13   ;;  %s565_s12 = sphi %s599_s12, %s834_s12   ;;  %s561_s11 = sphi %s597_s11, %s833_s11   ;;  %s557_s10 = sphi %s595_s10, %s832_s10   ;;  %s553_s9 = sphi %s593_s9, %s831_s9  }
   0x9   : > { %s33_s17 = sadd.s32 1, %s569_s13  ;;  %s42_s18 = sadd.s32 1, %s561_s11 }
   0xa   : > { %p35_p0 = scmp.ge.s32.totalorder %s33_s17, 2  ;;  %p49_p1 = scmp.ne.s32.totalorder %s561_s11, %s557_s10 }
   0xb   : > { %p50_p2 = scmp.eq.s32.totalorder %s573_s14, 0  ;;  %p55_p3 = scmp.ne.s32.totalorder %s557_s10, %s553_s9 }
   0xc   : > { %s837_s17 = smov (%p35_p0, %s33_s17), 0  ;;  %p56_p5 = scmp.eq.s32.totalorder %s343_s15, 0 }
   0xd   : > { %p634_p4 = por %p50_p2, %p49_p1  ;;  %s37_s20 = ssub.s32 %s569_s13, %s837_s17 }
   0xe   : > { %p107_p6 = scmp.eq.s32.totalorder %s343_s15, 1  ;;  %p40_p7 = scmp.eq.s32.totalorder %s37_s20, 0 }
   0xf   : > { %p640_p8 = por %p56_p5, %p55_p3  ;;  %p113_p10 = scmp.eq.s32.totalorder %s344_s16, 1 }
  0x10   : > { %p644_p9 = por %p107_p6, %p49_p1  ;;  %p376_p13 = scmp.lt.s32.totalorder %s573_s14, 2 }
  0x11   : > { %s819_s21 = scalar_select %p640_p8, 1, 0 }
  0x12   : > { %s820_s22 = scalar_select %p644_p9, 1, 0 }
  0x13   : > { %s649_s23 = scalar_select %p40_p7, %s561_s11, %s42_s18  }
  0x14   : > { %p651_p11 = por %p113_p10, %p55_p3  ;;  %s658_s25 = sand.u32 1, %s561_s11  }
  0x15   : > { %s347_s26 = sshll.u32 %s658_s25, 3  ;;  %s348_s27 = sshll.u32 %s569_s13, 7 }
  0x16   : > { %s821_s24 = scalar_select %p651_p11, 1, 0 }
  0x17   : > { %s667_s30 = scalar_lea.hbm %s813_s0, %s348_s27  ;;  %s137_s3 = scalar_lea.vmem [#allocation2], %s347_s26 }
  0x18   : > { %s145_s4 = sshll.u32 %s137_s3, 4  ;;  %p675_p0 = pnand %p376_p13, %p634_p4  ;;  %s671_s4 = int_to_ptr.vmem [resolvable:$true] %s145_s4 }
  0x19   : > { %s134_s6 = scalar_lea.sflag [#allocation3], %s658_s25  ;;  %s427_s7 = scalar_lea.hbm %s667_s30, 128 }
  0x1a   : > { %p428_p3 = scmp.ne.s32.totalorder %s667_s30, %s427_s7  ;;  %p429_p5 = pneg %p675_p0 }
  0x1b   : > { %s432_s16 = scalar_lea.hbm %s813_s0, 256  ;;  %p433_p4 = scmp.lt.u32.totalorder %s667_s30, %s813_s0 }
  0x1c   : > { %p430_p6 = pnand %p429_p5, %p428_p3  ;;  %p434_p10 = scmp.lt.u32.totalorder %s432_s16, %s427_s7 }
  0x1d   : > { %p436_p12 = scmp.lt.u32.totalorder %s427_s7, %s667_s30 }
  0x1e   : > { %p431_p7 = pneg %p430_p6  ;;  %p435_p13 = por %p434_p10, %p433_p4 }
  0x20   : > { %p437_p1 = por %p436_p12, %p435_p13 }
  0x22   : > { %p438_p2 = pnand %p437_p1, %p431_p7 }
  0x24   : > { %441 = shalt.err (!%p438_p2)
}
  0x25   : > { %s442_s20 = scalar_lea.vmem %s671_s4, 128  ;;  %s575_s28 = smov [#allocation2]  }
  0x26   : > { %p443_p3 = scmp.ne.s32.totalorder %s671_s4, %s442_s20  ;;  %s447_s29 = sshll.u32 %s575_s28, 4  ;;  %s448_s29 = int_to_ptr.vmem [resolvable:$false] %s447_s29 }
  0x27   : > { %s449_s3 = scalar_lea.vmem %s448_s29, 256  ;;  %p450_p9 = scmp.lt.s32.totalorder %s671_s4, %s448_s29 }
  0x28   : > { %p445_p6 = pnand %p443_p3, %p429_p5  ;;  %p451_p4 = scmp.lt.s32.totalorder %s449_s3, %s442_s20 }
  0x2a   : > { %p446_p11 = pneg %p445_p6  ;;  %p452_p10 = por %p451_p4, %p450_p9 }
  0x2c   : > { %p453_p12 = pnand %p452_p10, %p446_p11 }
  0x2e   : > { %456 = shalt.err (!%p453_p12)
}
  0x2f   : > { %368 = dma.hbm_to_vmem [thread:$0]  (!%p675_p0), %s667_s30, 128, %s671_s4, %s134_s6  }
  0x30   : > { %p823_p1 = scmp.lt.s32.totalorder %s573_s14, 3  ;;  %p824_p2 = scmp.ge.s32.totalorder %s573_s14, 1 }
  0x31   : > { %s720_s16 = scalar_lea.hbm %s814_s1, %s348_s27  ;;  %s156_s18 = scalar_lea.vmem [#allocation5], %s347_s26 }
  0x32   : > { %p711_p7 = pnand %p824_p2, %p823_p1  ;;  %s164_s19 = sshll.u32 %s156_s18, 4  ;;  %s165_s19 = int_to_ptr.vmem [resolvable:$true] %s164_s19 }
  0x33   : > { %s153_s30 = scalar_lea.sflag [#allocation6], %s658_s25  ;;  %s457_s4 = scalar_lea.hbm %s720_s16, 128 }
  0x34   : > { %s825_s7 = scalar_select %p711_p7, 1, 0 }
  0x35   : > { %p458_p9 = scmp.ne.s32.totalorder %s720_s16, %s457_s4  ;;  %s462_s27 = scalar_lea.hbm %s814_s1, 256 }
  0x36   : > { %p463_p3 = scmp.lt.u32.totalorder %s720_s16, %s814_s1  ;;  %p464_p6 = scmp.lt.u32.totalorder %s462_s27, %s457_s4 }
  0x37   : > { %p460_p11 = pnand %p458_p9, %p429_p5  ;;  %p466_p10 = scmp.lt.u32.totalorder %s457_s4, %s720_s16 }
  0x38   : > { %p465_p4 = por %p464_p6, %p463_p3 }
  0x39   : > { %p461_p13 = pneg %p460_p11 }
  0x3a   : > { %p467_p12 = por %p466_p10, %p465_p4 }
  0x3c   : > { %p468_p1 = pnand %p467_p12, %p461_p13 }
  0x3e   : > { %471 = shalt.err (!%p468_p1)
}
  0x3f   : > { %s472_s25 = scalar_lea.vmem %s165_s19, 128  ;;  %s576_s26 = smov [#allocation5]  }
  0x40   : > { %p473_p2 = scmp.ne.s32.totalorder %s165_s19, %s472_s25  ;;  %s477_s3 = sshll.u32 %s576_s26, 4  ;;  %s478_s3 = int_to_ptr.vmem [resolvable:$false] %s477_s3 }
  0x41   : > { %s479_s8 = scalar_lea.vmem %s478_s3, 256  ;;  %p480_p8 = scmp.lt.s32.totalorder %s165_s19, %s478_s3 }
  0x42   : > { %p475_p9 = pnand %p473_p2, %p429_p5  ;;  %p481_p7 = scmp.lt.s32.totalorder %s479_s8, %s472_s25 }
  0x44   : > { %p476_p11 = pneg %p475_p9  ;;  %p482_p3 = por %p481_p7, %p480_p8 }
  0x46   : > { %p483_p6 = pnand %p482_p3, %p476_p11 }
  0x48   : > { %486 = shalt.err (!%p483_p6)
}
  0x49   : > { %371 = dma.hbm_to_vmem [thread:$0]  (!%p675_p0), %s720_s16, 128, %s165_s19, %s153_s30  }
  0x4a   : > { %p826_p13 = scmp.ne.s32.totalorder %s825_s7, 0 }
  0x4b   : > { %s747_s15 = sand.u32 (!%p826_p13), 1, %s557_s10   ;;  %p827_p5 = scmp.ne.s32.totalorder (!%p826_p13), %s819_s21, 0 }
  0x4c   : > { %173 = sbr.rel (%p826_p13) target bundleno = 112 (0x70), region = 28  ;;  %s352_s18 = sshll.u32 (!%p826_p13), %s747_s15, 3 }
  0x4d   : > { %s176_s4 = scalar_lea.sflag (!%p826_p13), [#allocation3], %s747_s15  ;;  %s179_s6 = scalar_lea.vmem (!%p826_p13), [#allocation2], %s352_s18 }
  0x53   : > { %540 = dma.done.wait (%p827_p5), %s176_s4, 128  }
  0x54   : > { %542 = vsyncadd (%p827_p5), %s176_s4, 4294967168  ;;  %s185_s5 = scalar_lea.sflag [#allocation6], %s747_s15  ;;  %s188_s16 = scalar_lea.vmem [#allocation5], %s352_s18 }
  0x55   : > { %544 = dma.done.wait (%p827_p5), %s185_s5, 128  }
  0x56   : > { %546 = vsyncadd (%p827_p5), %s185_s5, 4294967168  ;;  %v219_v0 = vld [vmem:[%s179_s6] sm:$0xff]  ;;  %v220_v1 = vld [vmem:[%s188_s16] sm:$0xff]  ;;  %s356_s7 = sshll.u32 %s565_s12, 7  ;;  %s213_s19 = scalar_lea.vmem [#allocation7], %s352_s18 }
  0x57   : > { %s240_s30 = sshll.u32 %s213_s19, 4  ;;  %v221_v2 = vmul.f32 %v220_v1, %v219_v0  ;;  %s764_s28 = scalar_lea.hbm %s815_s2, %s356_s7  ;;  %s766_s30 = int_to_ptr.vmem [resolvable:$true] %s240_s30 }
  0x58   : > { %s227_s21 = scalar_lea.sflag [#allocation4], %s747_s15  ;;  %s487_s29 = scalar_lea.vmem %s766_s30, 128 }
  0x59   : > { %225 = vst [vmem:[%s213_s19] sm:$0xff] %v221_v2  ;;  %p488_p8 = scmp.ne.s32.totalorder %s766_s30, %s487_s29  ;;  %p828_p0 = scmp.ne.s32.totalorder %s820_s22, 0 }
  0x5a   : > { %s577_s12 = smov [#allocation7]  }
  0x5b   : > { %p489_p7 = pnand %p488_p8, %p828_p0  ;;  %s491_s25 = sshll.u32 %s577_s12, 4  ;;  %s492_s25 = int_to_ptr.vmem [resolvable:$false] %s491_s25 }
  0x5c   : > { %s493_s26 = scalar_lea.vmem %s492_s25, 256  ;;  %p494_p10 = scmp.lt.s32.totalorder %s766_s30, %s492_s25 }
  0x5d   : > { %p490_p4 = pneg %p489_p7  ;;  %p495_p12 = scmp.lt.s32.totalorder %s493_s26, %s487_s29 }
  0x5f   : > { %p496_p1 = por %p495_p12, %p494_p10 }
  0x61   : > { %p497_p2 = pnand %p496_p1, %p490_p4 }
  0x63   : > { %500 = shalt.err (!%p497_p2)
}
  0x64   : > { %s501_s3 = scalar_lea.hbm %s764_s28, 128  ;;  %s505_s18 = scalar_lea.hbm %s815_s2, 256 }
  0x65   : > { %p502_p9 = scmp.ne.s32.totalorder %s764_s28, %s501_s3  ;;  %p506_p6 = scmp.lt.u32.totalorder %s764_s28, %s815_s2 }
  0x66   : > { %p507_p13 = scmp.lt.u32.totalorder %s505_s18, %s501_s3  ;;  %p509_p8 = scmp.lt.u32.totalorder %s501_s3, %s764_s28 }
  0x67   : > { %p503_p11 = pnand %p502_p9, %p828_p0 }
  0x68   : > { %p508_p5 = por %p507_p13, %p506_p6 }
  0x69   : > { %p504_p3 = pneg %p503_p11 }
  0x6a   : > { %p510_p7 = por %p509_p8, %p508_p5 }
  0x6c   : > { %p511_p4 = pnand %p510_p7, %p504_p3 }
  0x6e   : > { %514 = shalt.err (!%p511_p4)
}
  0x6f   : > { %363 = dma.vmem_to_hbm [thread:$0]  (%p828_p0), %s766_s30, 128, %s764_s28, %s227_s21  }
  0x70 PF: > { %s252_s5 = sand.u32 1, %s553_s9   ;;  %p829_p10 = scmp.ne.s32.totalorder %s821_s24, 0 }
  0x71   : > { %p830_p12 = scmp.ge.s32.totalorder %s573_s14, 2  ;;  %s253_s16 = scalar_lea.sflag [#allocation4], %s252_s5 }
  0x73   : > { %p373_p1 = pnand %p830_p12, %p829_p10 }
  0x75   : > { %548 = dma.done.wait (!%p373_p1), %s253_s16, 128  }
  0x76   : > { %550 = vsyncadd (!%p373_p1), %s253_s16, 4294967168  ;;  %s21_s14 = sadd.s32 1, %s573_s14   ;;  %s831_s9 = smov %s557_s10 }
  0x77   : > { %p18_p2 = scmp.ge.s32.totalorder %s21_s14, 4   ;;  %s832_s10 = smov %s561_s11 }
  0x78   : > { %s833_s11 = smov %s649_s23  ;;  %s834_s12 = smov %s569_s13 }
  0x79   : > { %s835_s13 = smov %s837_s17  ;;  %20 = sbr.rel (!%p18_p2) target bundleno = 8 (0x8), region = 90 }
  0x80   :  { %258 = vsyncpa [#allocation3], 1 }
  0x81   :  { %260 = vsyncpa [#allocation3 + $0x1], 1 }
  0x82   :  { %261 = vsyncpa [#allocation6], 1 }
  0x83   :  { %263 = vsyncpa [#allocation6 + $0x1], 1 }
  0x84   :  { %264 = vsyncpa [#allocation4], 1 }
  0x85   :  { %266 = vsyncpa [#allocation4 + $0x1], 1 }

</bundles_post_ra>
